<compile_context>
chip_gen: v5e
topology: v5e:2x2
jax: 0.10.0
libtpu: 0.0.40
codegen_flags: <defaults>
</compile_context>

<pallas_src>
import jax
import jax.numpy as jnp
from jax.experimental import pallas as pl
from jax.experimental.pallas import tpu as pltpu


def _round_up(v, m):
    return (v + m - 1) // m * m


def fnn_kernel(x_ref, w1_ref, b1_ref, w2_ref, b2_ref, o_ref):
    # fc1: [tb, K] @ [K, H] — weights pre-transposed to MXU-canonical [K, N],
    # bf16 operands, f32 accumulation.
    x = x_ref[...].astype(w1_ref.dtype)
    h = jnp.dot(x, w1_ref[...], preferred_element_type=jnp.float32)
    h = jax.nn.sigmoid(h + b1_ref[...])            # logistic -> EUP
    # fc2: [tb, H] @ [H, N]
    y = jnp.dot(h.astype(w2_ref.dtype), w2_ref[...],
                preferred_element_type=jnp.float32)
    o_ref[...] = (y + b2_ref[...]).astype(o_ref.dtype)


def fnn_prepare_params(w1, b1, w2, b2, *, param_dtype=jnp.bfloat16):
    """One-time parameter prep (hoisted out of the per-call path).

    torch layout: w1 [hidden, in], w2 [out, hidden].
    Returns weights transposed to MXU-canonical [K, N] layout in bf16 and
    biases as f32 row vectors.
    """
    w1_t = jnp.asarray(w1, dtype=param_dtype).T          # [in, hidden]
    w2_t = jnp.asarray(w2, dtype=param_dtype).T          # [hidden, out]
    b1_p = jnp.asarray(b1, dtype=jnp.float32).reshape(1, -1)
    b2_p = jnp.asarray(b2, dtype=jnp.float32).reshape(1, -1)
    return w1_t, b1_p, w2_t, b2_p


def fnn_forward(x, params, *, tile_b=512, min_grid_steps=4):
    """Matches torch: sigmoid(x @ w1.T + b1) @ w2.T + b2 for x: [B, in]."""
    w1_t, b1_p, w2_t, b2_p = params
    B, in_dim = x.shape
    hidden_dim = w1_t.shape[1]
    out_dim = w2_t.shape[1]
    dtype = x.dtype

    # Batch tile: 16-aligned (bf16-native sublane tile).  If B is small, shrink
    # the tile so the grid keeps >= min_grid_steps steps (v7x megacore balance
    # + pipelining slack); otherwise use the large tile for low per-step
    # overhead.
    b_pad = _round_up(B, 16)
    tb = max(16, _round_up(min(tile_b, b_pad), 16))
    if b_pad // tb < min_grid_steps:
        tb = max(16, _round_up(pl.cdiv(b_pad, min_grid_steps), 16))
    B_p = _round_up(b_pad, tb)
    grid = (B_p // tb,)

    # Only the batch dim is ever padded (feature dims use full-dim blocks).
    x_p = x if B_p == B else jnp.zeros((B_p, in_dim), dtype).at[:B].set(x)

    wbytes = w1_t.dtype.itemsize
    resident_weight_bytes = 2 * wbytes * (in_dim * hidden_dim
                                          + hidden_dim * out_dim)
    assert resident_weight_bytes < 40 * 2**20, (
        "weights too large to stay VMEM-resident; see TODO(synk) at top of "
        "file for the K-tiled streaming fallback")

    # VMEM budget: double-buffered x/out tiles + resident weights/biases + the
    # f32 intermediate, with 2x headroom, clamped to 48 MiB (valid on v7x too).
    est = (2 * tb * in_dim * x.dtype.itemsize          # x tiles
           + 2 * tb * out_dim * dtype.itemsize         # out tiles
           + resident_weight_bytes                     # w1_t + w2_t
           + 2 * 4 * (hidden_dim + out_dim)            # biases
           + tb * hidden_dim * 4)                      # h intermediate
    vmem_limit = int(min(48 * 2**20, max(4 * 2**20, 2 * est)))

    cost = pl.CostEstimate(
        flops=2 * B_p * (in_dim * hidden_dim + hidden_dim * out_dim),
        transcendentals=B_p * hidden_dim,
        bytes_accessed=(B_p * in_dim * x.dtype.itemsize
                        + in_dim * hidden_dim * wbytes
                        + hidden_dim * out_dim * wbytes
                        + 4 * (hidden_dim + out_dim)
                        + B_p * out_dim * dtype.itemsize),
    )

    out_arr = pl.pallas_call(
        fnn_kernel,
        out_shape=jax.ShapeDtypeStruct((B_p, out_dim), dtype),
        grid_spec=pltpu.PrefetchScalarGridSpec(
            num_scalar_prefetch=0,
            grid=grid,
            in_specs=[
                pl.BlockSpec((tb, in_dim), lambda i: (i, 0)),          # x (streamed)
                pl.BlockSpec((in_dim, hidden_dim), lambda i: (0, 0)),  # w1.T (resident)
                pl.BlockSpec((1, hidden_dim), lambda i: (0, 0)),       # b1
                pl.BlockSpec((hidden_dim, out_dim), lambda i: (0, 0)), # w2.T (resident)
                pl.BlockSpec((1, out_dim), lambda i: (0, 0)),          # b2
            ],
            out_specs=pl.BlockSpec((tb, out_dim), lambda i: (i, 0)),
        ),
        compiler_params=pltpu.CompilerParams(
            dimension_semantics=("parallel",),
            vmem_limit_bytes=vmem_limit,
        ),
        cost_estimate=cost,
    )(x_p, w1_t, b1_p, w2_t, b2_p)

    return out_arr if B_p == B else out_arr[:B]


def fnn_reference(x, w1, b1, w2, b2):
    h = jax.nn.sigmoid(x @ w1.T + b1)
    return h @ w2.T + b2


if __name__ == "__main__":
    # Small shapes consistent with FNN(input_dim=16, hidden_dim=32, output_dim=8).
    batch, input_dim, hidden_dim, output_dim = 64, 16, 32, 8

    key = jax.random.PRNGKey(0)
    kx, k1, k2, k3, k4 = jax.random.split(key, 5)

    x = jax.random.normal(kx, (batch, input_dim), dtype=jnp.float32)
    bound1 = 1.0 / (input_dim ** 0.5)
    bound2 = 1.0 / (hidden_dim ** 0.5)
    w1 = jax.random.uniform(k1, (hidden_dim, input_dim), minval=-bound1, maxval=bound1)
    b1 = jax.random.uniform(k2, (hidden_dim,), minval=-bound1, maxval=bound1)
    w2 = jax.random.uniform(k3, (output_dim, hidden_dim), minval=-bound2, maxval=bound2)
    b2 = jax.random.uniform(k4, (output_dim,), minval=-bound2, maxval=bound2)

    params = fnn_prepare_params(w1, b1, w2, b2)       # one-time prep
    out = fnn_forward(x, params)                       # grid shrinks tile_b -> 4 steps
    jax.block_until_ready(out)

    ref = fnn_reference(x, w1, b1, w2, b2)
    assert out.shape == (batch, output_dim)
    # bf16 weights => looser tolerance vs. the f32 reference.
    assert jnp.allclose(out, ref, atol=3e-2, rtol=3e-2), \
        float(jnp.max(jnp.abs(out - ref)))

    print("KERNEL_OK")
</pallas_src>

<mosaic_0001>
module attributes {stable_mosaic.version = 11 : i64} {
  func.func @fnn_kernel(%arg0: i32, %arg1: memref<16x16xf32, #tpu.memory_space<vmem>>, %arg2: memref<16x32xbf16, #tpu.memory_space<vmem>>, %arg3: memref<1x32xf32, #tpu.memory_space<vmem>>, %arg4: memref<32x8xbf16, #tpu.memory_space<vmem>>, %arg5: memref<1x8xf32, #tpu.memory_space<vmem>>, %arg6: memref<16x8xf32, #tpu.memory_space<vmem>>) attributes {dimension_semantics = [#tpu.dimension_semantics<parallel>], iteration_bounds = array<i64: 4>, scalar_prefetch = 0 : i64, scratch_operands = 0 : i64, tpu.core_type = #tpu.core_type<tc>, window_params = [{transform_indices = @transform_0, window_bounds = array<i64: 16, 16>}, {pipeline_mode = #tpu.pipeline_mode<synchronous>, transform_indices = @transform_1, window_bounds = array<i64: 16, 32>}, {pipeline_mode = #tpu.pipeline_mode<synchronous>, transform_indices = @transform_2, window_bounds = array<i64: 1, 32>}, {pipeline_mode = #tpu.pipeline_mode<synchronous>, transform_indices = @transform_3, window_bounds = array<i64: 32, 8>}, {pipeline_mode = #tpu.pipeline_mode<synchronous>, transform_indices = @transform_4, window_bounds = array<i64: 1, 8>}, {transform_indices = @transform_5, window_bounds = array<i64: 16, 8>}]} {
    %c0 = arith.constant 0 : index
    %c0_0 = arith.constant 0 : index
    %0 = vector.load %arg1[%c0, %c0_0] : memref<16x16xf32, #tpu.memory_space<vmem>>, vector<16x16xf32>
    %1 = arith.truncf %0 : vector<16x16xf32> to vector<16x16xbf16>
    %c0_1 = arith.constant 0 : index
    %c0_2 = arith.constant 0 : index
    %2 = vector.load %arg2[%c0_1, %c0_2] : memref<16x32xbf16, #tpu.memory_space<vmem>>, vector<16x32xbf16>
    %cst = arith.constant dense<0.000000e+00> : vector<16x32xf32>
    %3 = tpu.matmul %1, %2, %cst {dimension_numbers = #tpu.dot_dimension_numbers<[1], [0], [0], [1], [0, 0, 1, 1], [], []>} : vector<16x16xbf16>, vector<16x32xbf16>, vector<16x32xf32> -> vector<16x32xf32>
    %c0_3 = arith.constant 0 : index
    %c0_4 = arith.constant 0 : index
    %4 = vector.load %arg3[%c0_3, %c0_4] : memref<1x32xf32, #tpu.memory_space<vmem>>, vector<1x32xf32>
    %5 = vector.broadcast %4 : vector<1x32xf32> to vector<16x32xf32>
    %6 = arith.addf %3, %5 : vector<16x32xf32>
    %7 = arith.negf %6 : vector<16x32xf32>
    %8 = math.exp %7 : vector<16x32xf32>
    %cst_5 = arith.constant 1.000000e+00 : f32
    %9 = vector.broadcast %cst_5 : f32 to vector<16x32xf32>
    %10 = arith.addf %9, %8 : vector<16x32xf32>
    %11 = arith.divf %9, %10 : vector<16x32xf32>
    %12 = arith.truncf %11 : vector<16x32xf32> to vector<16x32xbf16>
    %c0_6 = arith.constant 0 : index
    %c0_7 = arith.constant 0 : index
    %13 = vector.load %arg4[%c0_6, %c0_7] : memref<32x8xbf16, #tpu.memory_space<vmem>>, vector<32x8xbf16>
    %cst_8 = arith.constant dense<0.000000e+00> : vector<16x8xf32>
    %14 = tpu.matmul %12, %13, %cst_8 {dimension_numbers = #tpu.dot_dimension_numbers<[1], [0], [0], [1], [0, 0, 1, 1], [], []>} : vector<16x32xbf16>, vector<32x8xbf16>, vector<16x8xf32> -> vector<16x8xf32>
    %c0_9 = arith.constant 0 : index
    %c0_10 = arith.constant 0 : index
    %15 = vector.load %arg5[%c0_9, %c0_10] : memref<1x8xf32, #tpu.memory_space<vmem>>, vector<1x8xf32>
    %16 = vector.broadcast %15 : vector<1x8xf32> to vector<16x8xf32>
    %17 = arith.addf %14, %16 : vector<16x8xf32>
    %c0_11 = arith.constant 0 : index
    %c0_12 = arith.constant 0 : index
    %18 = vector.load %arg6[%c0_11, %c0_12] : memref<16x8xf32, #tpu.memory_space<vmem>>, vector<16x8xf32>
    tpu.vector_store %arg6[%c0_11, %c0_12], %17 {strides = array<i32>} : memref<16x8xf32, #tpu.memory_space<vmem>>, vector<16x8xf32>,
    return
  }
  func.func @transform_0(%arg0: i32) -> (i32, i32) {
    %c0_i32 = arith.constant 0 : i32
    %c0_i32_0 = arith.constant 0 : i32
    return %arg0, %c0_i32 : i32, i32
  }
  func.func @transform_1(%arg0: i32) -> (i32, i32) {
    %c0_i32 = arith.constant 0 : i32
    %c0_i32_0 = arith.constant 0 : i32
    %c0_i32_1 = arith.constant 0 : i32
    return %c0_i32, %c0_i32_0 : i32, i32
  }
  func.func @transform_2(%arg0: i32) -> (i32, i32) {
    %c0_i32 = arith.constant 0 : i32
    %c0_i32_0 = arith.constant 0 : i32
    %c0_i32_1 = arith.constant 0 : i32
    return %c0_i32, %c0_i32_0 : i32, i32
  }
  func.func @transform_3(%arg0: i32) -> (i32, i32) {
    %c0_i32 = arith.constant 0 : i32
    %c0_i32_0 = arith.constant 0 : i32
    %c0_i32_1 = arith.constant 0 : i32
    return %c0_i32, %c0_i32_0 : i32, i32
  }
  func.func @transform_4(%arg0: i32) -> (i32, i32) {
    %c0_i32 = arith.constant 0 : i32
    %c0_i32_0 = arith.constant 0 : i32
    %c0_i32_1 = arith.constant 0 : i32
    return %c0_i32, %c0_i32_0 : i32, i32
  }
  func.func @transform_5(%arg0: i32) -> (i32, i32) {
    %c0_i32 = arith.constant 0 : i32
    %c0_i32_0 = arith.constant 0 : i32
    return %arg0, %c0_i32 : i32, i32
  }
}

</mosaic_0001>

<bundles_post_ra>
// kernel: tpu_custom_call.1
= control target key start
LH: loop header
LB: loop body
LE: loop exit
PB: predicated region body
PF: predicated region fallthrough
CT: control target
= control target key end

     0   :  { %s484_s18 = smov 0   ;;  %s523_s0 = inlined_call_operand.vmem [shape: f32[64,16], index: 0, kind: input, shape index: {}]   ;;  %s524_s1 = inlined_call_operand.vmem [shape: bf16[16,32], index: 1, kind: input, shape index: {}]   ;;  %s525_s2 = inlined_call_operand.vmem [shape: f32[1,32], index: 2, kind: input, shape index: {}]   ;;  %s526_s3 = inlined_call_operand.vmem [shape: bf16[32,8], index: 3, kind: input, shape index: {}]   ;;  %s527_s4 = inlined_call_operand.vmem [shape: f32[1,8], index: 4, kind: input, shape index: {}]   ;;  %s528_s5 = inlined_call_operand.vmem [shape: f32[64,8], index: 5, kind: output, shape index: {}]  }
   0x1 LB: > { %s398_s19 = sadd.s32 4294967295, %s452_s18   ;;  %p402_p0 = scmp.ge.s32.totalorder %s452_s18, 1  ;;  %s452_s18 = sphi %s484_s18, %s15_s18  }
   0x2   : > { %p188_p1 = scmp.lt.s32.totalorder %s452_s18, 5 }
   0x4   : > { %p189_p2 = pnand %p402_p0, %p188_p1 }
   0x5   : > { %s403_s22 = sshll.u32 (!%p189_p2), %s398_s19, 1 }
   0x6   : > { %192 = sbr.rel (%p189_p2) target bundleno = 320 (0x140), region = 40  ;;  %p217_p3 = scmp.lt.s32.totalorder (!%p189_p2), %s403_s22, 7 }
   0xb   : > { %v425_v0 = vld [vmem:[%s524_s1] sm:$0xff]  ;;  %s530_s22 = smov (!%p217_p3, %s403_s22), 7  ;;  %vm244_vm0 = vcmask 130048   ;;  %v427_v5 = vld [vmem:[%s526_s3 + $0x8] sm:$0xff]  ;;  %vm321_vm9 = vcmask 261120   ;;  %vm339_vm10 = vcmask 64512  }
   0xc   : > { %255 = vmatpush.bf16.msra.mxu0 %v425_v0  ;;  %s404_s23 = sshll.u32 %s530_s22, 3  ;;  %v436_v4 = vld [vmem:[%s525_s2] ss:$0 sm:$0xff]  ;;  %331 = vmatpush.bf16.msra.mxu1 %v427_v5 }
   0xd   : > { %s220_s26 = scalar_lea.vmem %s523_s0, %s404_s23  ;;  %v426_v6 = vld [vmem:[%s526_s3] sm:$0xff]  ;;  %s226_s12 = scalar_lea.vmem %s528_s5, %s404_s23 }
   0xe   : > { %v229_v1 = vld [vmem:[%s220_s26] sm:$0xff]  ;;  %v230_v2 = vld [vmem:[%s220_s26 + $0x8] sm:$0xff] }
   0xf   : > { %v231_v3 = vpack.c.bf16 %v230_v2, %v229_v1  ;;  %v437_v38 = vld [vmem:[%s527_s4] ss:$0 sm:$0xff] }
  0x10   : > { %332 = vmatpush.bf16.msra.mxu1 %v426_v6 }
  0x11   : > { %411 = vmatmul.msk.bf16.vlgmr.msra.gmra.mxu0 %vm244_vm0, %v231_v3 }
  0x8e   : > { %v257_v7 = vpop.f32.mrf.mxu0 }
  0x8f   : > { %v258_v8 = vadd.f32 %v436_v4, %v257_v7 }
  0x91   : > { %v412_v9 = vmul.f32 -1.442695, %v258_v8 }
  0x93   : > { %438 = vpow2.f32 %v412_v9 }
  0x96   : > { %v259_v10 = vpop.f32.mrf.mxu0 }
  0x97   : > { %v260_v11 = vadd.f32 %v436_v4, %v259_v10 }
  0x99   : > { %v439_v12 = vpop.eup %438  ;;  %v413_v13 = vmul.f32 -1.442695, %v260_v11 }
  0x9a   : > { %v268_v14 = vadd.f32 1.0, %v439_v12 }
  0x9b   : > { %440 = vpow2.f32 %v413_v13 }
  0x9c   : > { %442 = vrcp.f32 %v268_v14  ;;  %vm275_vm2 = vweird.f32 %v268_v14  ;;  %v281_v25 = vand.u32 2147483648, %v268_v14  ;;  %v279_v27 = vand.u32 2147483647, %v268_v14 }
  0x9e   : > { %v282_v32 = vor.u32 1.1754944e-38, %v281_v25  ;;  %vm280_vm7 = vcmp.eq.f32.partialorder %v279_v27, 8.507059e+37 }
  0xa1   : > { %v441_v15 = vpop.eup %440 }
  0xa2   : > { %v443_v16 = vpop.eup %442  ;;  %v269_v17 = vadd.f32 1.0, %v441_v15 }
  0xa3   : > { %v271_v18 = vmul.f32 %v443_v16, %v268_v14  ;;  %vm276_vm1 = vweird.f32 %v443_v16 }
  0xa4   : > { %444 = vrcp.f32 %v269_v17  ;;  %v296_v26 = vand.u32 2147483648, %v269_v17  ;;  %v294_v29 = vand.u32 2147483647, %v269_v17  ;;  %vm277_vm4 = vmor %vm275_vm2, %vm276_vm1  ;;  %vm290_vm5 = vweird.f32 %v269_v17 }
  0xa5   : > { %v272_v19 = vsub.f32 1.0, %v271_v18 }
  0xa6   : > { %v297_v33 = vor.u32 1.1754944e-38, %v296_v26  ;;  %vm295_vm8 = vcmp.eq.f32.partialorder %v294_v29, 8.507059e+37 }
  0xa7   : > { %v273_v20 = vmul.f32 %v443_v16, %v272_v19 }
  0xa9   : > { %v274_v23 = vadd.f32 %v443_v16, %v273_v20 }
  0xaa   : > { %v445_v21 = vpop.eup %444 }
  0xab   : > { %v286_v22 = vmul.f32 %v445_v21, %v269_v17  ;;  %vm291_vm3 = vweird.f32 %v445_v21  ;;  %v278_v30 = vsel %vm277_vm4, %v443_v16, %v274_v23 }
  0xac   : > { %vm292_vm6 = vmor %vm290_vm5, %vm291_vm3  ;;  %v283_v35 = vsel %vm280_vm7, %v282_v32, %v278_v30 }
  0xad   : > { %v287_v24 = vsub.f32 1.0, %v286_v22 }
  0xaf   : > { %v288_v28 = vmul.f32 %v445_v21, %v287_v24 }
  0xb1   : > { %v289_v31 = vadd.f32 %v445_v21, %v288_v28 }
  0xb3   : > { %v293_v34 = vsel %vm292_vm6, %v445_v21, %v289_v31 }
  0xb4   : > { %v298_v36 = vsel %vm295_vm8, %v297_v33, %v293_v34 }
  0xb5   : > { %v300_v37 = vpack.c.bf16 %v298_v36, %v283_v35 }
  0xb7   : > { %422 = vmatmul.msk.bf16.vlgmr.msra.gmra.mxu1 %vm321_vm9, %v300_v37 }
 0x134   : > { %v334_v39 = vpop.f32.mrf.mxu1 }
 0x135   : > { %v335_v40 = vadd.f32 %v437_v38, %v334_v39 }
 0x137   : > { %340 = vst.msk [vmem:[%s226_s12] sm:$0xff] %vm339_vm10, %v335_v40 }
 0x13c   : > { %v336_v41 = vpop.f32.mrf.mxu1 }
 0x13d   : > { %v337_v42 = vadd.f32 %v437_v38, %v336_v41 }
 0x13f   : > { %341 = vst.msk [vmem:[%s226_s12 + $0x8] sm:$0xff] %vm339_vm10, %v337_v42 }
 0x140 PF: > { %s15_s18 = sadd.s32 1, %s452_s18  }
 0x141   : > { %p12_p4 = scmp.ge.s32.totalorder %s15_s18, 6  }
 0x143   :  { %14 = sbr.rel (!%p12_p4) target bundleno = 1 (0x1), region = 70 }

</bundles_post_ra>
